<compile_context>
chip_gen: v7x
topology: tpu7x:2x2x1
jax: 0.10.0
libtpu: 0.0.40
codegen_flags: <defaults>
</compile_context>

<pallas_src>
import functools

import jax
import jax.numpy as jnp
import numpy as np
from jax import lax
from jax.experimental import pallas as pl
from jax.experimental.pallas import tpu as pltpu


def _round_up(x, m):
    return ((x + m - 1) // m) * m


def _make_conv_bn_relu_kernel(tap_offsets, l_out):
    """Fused conv-taps + bias + ReLU; one padded image per grid step."""

    def kernel(x_ref, w_ref, b_ref, o_ref):
        # x_ref: (1, Cin_p, L_in)   bf16  zero-padded, flattened image
        # w_ref: (T, Cout, Cin_p)   bf16  BN-scale-folded weights (T = KH*KW)
        # b_ref: (Cout, 1)          f32   folded BN bias
        # o_ref: (1, Cout, L_out)         flat pixels on the lane axis
        acc = None
        for t, off in enumerate(tap_offsets):        # static unroll over taps
            x_t = x_ref[0, :, pl.ds(off, l_out)]     # shifted (Cin_p, L_out) window
            contrib = jnp.dot(w_ref[t], x_t, preferred_element_type=jnp.float32)
            acc = contrib if acc is None else acc + contrib
        y = acc + b_ref[...]                         # (Cout, 1) broadcast over lanes
        o_ref[0] = jnp.maximum(y, 0.0).astype(o_ref.dtype)

    return kernel


@functools.partial(jax.jit,
                   static_argnames=("stride", "padding", "eps", "out_dtype"))
def conv_layer_forward(x_nchw, weight_oihw, gamma, beta, run_mean, run_var,
                       *, stride=1, padding=0, eps=1e-5, out_dtype=jnp.float32):
    """ConvLayer.forward: conv(no bias) -> BatchNorm(eval) -> ReLU.  NCHW in/out."""
    n, cin, h, w = x_nchw.shape
    cout, _, kh, kw = weight_oihw.shape

    hp, wp = h + 2 * padding, w + 2 * padding
    oh1, ow1 = hp - kh + 1, wp - kw + 1            # stride-1 output extent
    oh = (hp - kh) // stride + 1
    ow = (wp - kw) // stride + 1

    # ---- plain-JAX glue (all input-sized; no im2col expansion) --------------
    cin_p = _round_up(cin, 8)                      # sublane-align channels
    l_valid = oh1 * wp                             # flat pixel count we compute
    l_out = _round_up(l_valid, 128)                # lane-dense output width
    max_off = (kh - 1) * wp + (kw - 1)             # largest tap shift
    l_in = _round_up(l_out + max_off, 128)         # input row length incl. halo

    # Fold BN (inference) into the conv weight / per-channel bias.
    scale = gamma / jnp.sqrt(run_var + eps)                          # (Cout,)
    bias = (beta - run_mean * scale).astype(jnp.float32).reshape(cout, 1)
    w_folded = weight_oihw * scale[:, None, None, None]              # (Cout,Cin,KH,KW)
    w_taps = jnp.transpose(w_folded, (2, 3, 0, 1)).reshape(kh * kw, cout, cin)
    w_taps = jnp.pad(w_taps, ((0, 0), (0, 0), (0, cin_p - cin)))
    w_taps = w_taps.astype(jnp.bfloat16)

    # Zero-pad spatially, flatten H*W, pad channels / row length, cast to bf16.
    xp = jnp.pad(x_nchw, ((0, 0), (0, 0), (padding, padding), (padding, padding)))
    xp = xp.reshape(n, cin, hp * wp)
    xp = jnp.pad(xp, ((0, 0), (0, cin_p - cin), (0, l_in - hp * wp)))
    xp = xp.astype(jnp.bfloat16)

    tap_offsets = tuple(i * wp + j for i in range(kh) for j in range(kw))
    kernel = _make_conv_bn_relu_kernel(tap_offsets, l_out)

    out_flat = pl.pallas_call(
        kernel,
        out_shape=jax.ShapeDtypeStruct((n, cout, l_out), out_dtype),
        grid=(n,),
        in_specs=[
            pl.BlockSpec((1, cin_p, l_in), lambda i: (i, 0, 0)),
            pl.BlockSpec((kh * kw, cout, cin_p), lambda i: (0, 0, 0)),
            pl.BlockSpec((cout, 1), lambda i: (0, 0)),
        ],
        out_specs=pl.BlockSpec((1, cout, l_out), lambda i: (i, 0, 0)),
        compiler_params=pltpu.CompilerParams(
            dimension_semantics=("parallel",),
            vmem_limit_bytes=48 * 1024 * 1024),
    )(xp, w_taps, bias)

    # Columns >= l_valid and the last (kw-1) columns of each spatial row are
    # wrap/padding junk (finite: relu(bias)); they are sliced away here and are
    # never visible to callers.
    out = out_flat[:, :, :l_valid].reshape(n, cout, oh1, wp)[:, :, :, :ow1]
    if stride > 1:
        out = out[:, :, ::stride, ::stride]
    assert out.shape[2:] == (oh, ow)
    return out


if __name__ == "__main__":
    key = jax.random.PRNGKey(0)
    k_x, k_w, k_g, k_b, k_m, k_v = jax.random.split(key, 6)

    # Shapes consistent with ConvLayer(in=4, out=8, kernel=3, stride=1, padding=1)
    N, Cin, H, W = 2, 4, 16, 16
    Cout, KH, KW = 8, 3, 3
    stride, padding = 1, 1
    eps = 1e-5

    x = jax.random.normal(k_x, (N, Cin, H, W), dtype=jnp.float32)
    weight = jax.random.normal(k_w, (Cout, Cin, KH, KW), dtype=jnp.float32) * 0.1
    gamma = jax.random.uniform(k_g, (Cout,), minval=0.5, maxval=1.5, dtype=jnp.float32)
    beta = jax.random.normal(k_b, (Cout,), dtype=jnp.float32) * 0.1
    run_mean = jax.random.normal(k_m, (Cout,), dtype=jnp.float32) * 0.1
    run_var = jax.random.uniform(k_v, (Cout,), minval=0.5, maxval=1.5, dtype=jnp.float32)

    out = conv_layer_forward(x, weight, gamma, beta, run_mean, run_var,
                             stride=stride, padding=padding, eps=eps)
    out = jax.block_until_ready(out)

    # Pure-JAX reference with the same bf16 operand rounding / f32 accumulation.
    scale = gamma / jnp.sqrt(run_var + eps)
    w_ref = (weight * scale[:, None, None, None]).astype(jnp.bfloat16)
    bias = beta - run_mean * scale
    ref_conv = lax.conv_general_dilated(
        x.astype(jnp.bfloat16), w_ref, window_strides=(stride, stride),
        padding=[(padding, padding), (padding, padding)],
        dimension_numbers=("NCHW", "OIHW", "NCHW"),
        preferred_element_type=jnp.float32)
    ref = jnp.maximum(ref_conv + bias[None, :, None, None], 0.0)

    assert out.shape == (N, Cout, H, W), out.shape
    np.testing.assert_allclose(np.asarray(out), np.asarray(ref),
                               rtol=1e-3, atol=1e-3)
    print("KERNEL_OK")
</pallas_src>

<mosaic_0001>
module attributes {stable_mosaic.version = 11 : i64} {
  func.func @kernel(%arg0: i32, %arg1: memref<1x8x512xbf16, #tpu.memory_space<vmem>>, %arg2: memref<9x8x8xbf16, #tpu.memory_space<vmem>>, %arg3: memref<8x1xf32, #tpu.memory_space<vmem>>, %arg4: memref<1x8x384xf32, #tpu.memory_space<vmem>>) attributes {dimension_semantics = [#tpu.dimension_semantics<parallel>], iteration_bounds = array<i64: 2>, scalar_prefetch = 0 : i64, scratch_operands = 0 : i64, tpu.core_type = #tpu.core_type<tc>, window_params = [{transform_indices = @transform_0, window_bounds = array<i64: 1, 8, 512>}, {pipeline_mode = #tpu.pipeline_mode<synchronous>, transform_indices = @transform_1, window_bounds = array<i64: 9, 8, 8>}, {pipeline_mode = #tpu.pipeline_mode<synchronous>, transform_indices = @transform_2, window_bounds = array<i64: 8, 1>}, {transform_indices = @transform_3, window_bounds = array<i64: 1, 8, 384>}]} {
    %c0 = arith.constant 0 : index
    %c0_0 = arith.constant 0 : index
    %c0_1 = arith.constant 0 : index
    %0 = vector.load %arg1[%c0, %c0_0, %c0_1] : memref<1x8x512xbf16, #tpu.memory_space<vmem>>, vector<1x8x384xbf16>
    %1 = vector.shape_cast %0 : vector<1x8x384xbf16> to vector<8x384xbf16>
    %c0_2 = arith.constant 0 : index
    %c0_3 = arith.constant 0 : index
    %c0_4 = arith.constant 0 : index
    %2 = vector.load %arg2[%c0_2, %c0_3, %c0_4] : memref<9x8x8xbf16, #tpu.memory_space<vmem>>, vector<1x8x8xbf16>
    %3 = vector.shape_cast %2 : vector<1x8x8xbf16> to vector<8x8xbf16>
    %cst = arith.constant dense<0.000000e+00> : vector<8x384xf32>
    %4 = tpu.matmul %3, %1, %cst {dimension_numbers = #tpu.dot_dimension_numbers<[1], [0], [0], [1], [0, 0, 1, 1], [], []>} : vector<8x8xbf16>, vector<8x384xbf16>, vector<8x384xf32> -> vector<8x384xf32>
    %c0_5 = arith.constant 0 : index
    %c0_6 = arith.constant 0 : index
    %c1 = arith.constant 1 : index
    %5 = vector.load %arg1[%c0_5, %c0_6, %c1] : memref<1x8x512xbf16, #tpu.memory_space<vmem>>, vector<1x8x384xbf16>
    %6 = vector.shape_cast %5 : vector<1x8x384xbf16> to vector<8x384xbf16>
    %c1_7 = arith.constant 1 : index
    %c0_8 = arith.constant 0 : index
    %c0_9 = arith.constant 0 : index
    %7 = vector.load %arg2[%c1_7, %c0_8, %c0_9] : memref<9x8x8xbf16, #tpu.memory_space<vmem>>, vector<1x8x8xbf16>
    %8 = vector.shape_cast %7 : vector<1x8x8xbf16> to vector<8x8xbf16>
    %cst_10 = arith.constant dense<0.000000e+00> : vector<8x384xf32>
    %9 = tpu.matmul %8, %6, %cst_10 {dimension_numbers = #tpu.dot_dimension_numbers<[1], [0], [0], [1], [0, 0, 1, 1], [], []>} : vector<8x8xbf16>, vector<8x384xbf16>, vector<8x384xf32> -> vector<8x384xf32>
    %10 = arith.addf %4, %9 : vector<8x384xf32>
    %c0_11 = arith.constant 0 : index
    %c0_12 = arith.constant 0 : index
    %c2 = arith.constant 2 : index
    %11 = vector.load %arg1[%c0_11, %c0_12, %c2] : memref<1x8x512xbf16, #tpu.memory_space<vmem>>, vector<1x8x384xbf16>
    %12 = vector.shape_cast %11 : vector<1x8x384xbf16> to vector<8x384xbf16>
    %c2_13 = arith.constant 2 : index
    %c0_14 = arith.constant 0 : index
    %c0_15 = arith.constant 0 : index
    %13 = vector.load %arg2[%c2_13, %c0_14, %c0_15] : memref<9x8x8xbf16, #tpu.memory_space<vmem>>, vector<1x8x8xbf16>
    %14 = vector.shape_cast %13 : vector<1x8x8xbf16> to vector<8x8xbf16>
    %cst_16 = arith.constant dense<0.000000e+00> : vector<8x384xf32>
    %15 = tpu.matmul %14, %12, %cst_16 {dimension_numbers = #tpu.dot_dimension_numbers<[1], [0], [0], [1], [0, 0, 1, 1], [], []>} : vector<8x8xbf16>, vector<8x384xbf16>, vector<8x384xf32> -> vector<8x384xf32>
    %16 = arith.addf %10, %15 : vector<8x384xf32>
    %c0_17 = arith.constant 0 : index
    %c0_18 = arith.constant 0 : index
    %c18 = arith.constant 18 : index
    %17 = vector.load %arg1[%c0_17, %c0_18, %c18] : memref<1x8x512xbf16, #tpu.memory_space<vmem>>, vector<1x8x384xbf16>
    %18 = vector.shape_cast %17 : vector<1x8x384xbf16> to vector<8x384xbf16>
    %c3 = arith.constant 3 : index
    %c0_19 = arith.constant 0 : index
    %c0_20 = arith.constant 0 : index
    %19 = vector.load %arg2[%c3, %c0_19, %c0_20] : memref<9x8x8xbf16, #tpu.memory_space<vmem>>, vector<1x8x8xbf16>
    %20 = vector.shape_cast %19 : vector<1x8x8xbf16> to vector<8x8xbf16>
    %cst_21 = arith.constant dense<0.000000e+00> : vector<8x384xf32>
    %21 = tpu.matmul %20, %18, %cst_21 {dimension_numbers = #tpu.dot_dimension_numbers<[1], [0], [0], [1], [0, 0, 1, 1], [], []>} : vector<8x8xbf16>, vector<8x384xbf16>, vector<8x384xf32> -> vector<8x384xf32>
    %22 = arith.addf %16, %21 : vector<8x384xf32>
    %c0_22 = arith.constant 0 : index
    %c0_23 = arith.constant 0 : index
    %c19 = arith.constant 19 : index
    %23 = vector.load %arg1[%c0_22, %c0_23, %c19] : memref<1x8x512xbf16, #tpu.memory_space<vmem>>, vector<1x8x384xbf16>
    %24 = vector.shape_cast %23 : vector<1x8x384xbf16> to vector<8x384xbf16>
    %c4 = arith.constant 4 : index
    %c0_24 = arith.constant 0 : index
    %c0_25 = arith.constant 0 : index
    %25 = vector.load %arg2[%c4, %c0_24, %c0_25] : memref<9x8x8xbf16, #tpu.memory_space<vmem>>, vector<1x8x8xbf16>
    %26 = vector.shape_cast %25 : vector<1x8x8xbf16> to vector<8x8xbf16>
    %cst_26 = arith.constant dense<0.000000e+00> : vector<8x384xf32>
    %27 = tpu.matmul %26, %24, %cst_26 {dimension_numbers = #tpu.dot_dimension_numbers<[1], [0], [0], [1], [0, 0, 1, 1], [], []>} : vector<8x8xbf16>, vector<8x384xbf16>, vector<8x384xf32> -> vector<8x384xf32>
    %28 = arith.addf %22, %27 : vector<8x384xf32>
    %c0_27 = arith.constant 0 : index
    %c0_28 = arith.constant 0 : index
    %c20 = arith.constant 20 : index
    %29 = vector.load %arg1[%c0_27, %c0_28, %c20] : memref<1x8x512xbf16, #tpu.memory_space<vmem>>, vector<1x8x384xbf16>
    %30 = vector.shape_cast %29 : vector<1x8x384xbf16> to vector<8x384xbf16>
    %c5 = arith.constant 5 : index
    %c0_29 = arith.constant 0 : index
    %c0_30 = arith.constant 0 : index
    %31 = vector.load %arg2[%c5, %c0_29, %c0_30] : memref<9x8x8xbf16, #tpu.memory_space<vmem>>, vector<1x8x8xbf16>
    %32 = vector.shape_cast %31 : vector<1x8x8xbf16> to vector<8x8xbf16>
    %cst_31 = arith.constant dense<0.000000e+00> : vector<8x384xf32>
    %33 = tpu.matmul %32, %30, %cst_31 {dimension_numbers = #tpu.dot_dimension_numbers<[1], [0], [0], [1], [0, 0, 1, 1], [], []>} : vector<8x8xbf16>, vector<8x384xbf16>, vector<8x384xf32> -> vector<8x384xf32>
    %34 = arith.addf %28, %33 : vector<8x384xf32>
    %c0_32 = arith.constant 0 : index
    %c0_33 = arith.constant 0 : index
    %c36 = arith.constant 36 : index
    %35 = vector.load %arg1[%c0_32, %c0_33, %c36] : memref<1x8x512xbf16, #tpu.memory_space<vmem>>, vector<1x8x384xbf16>
    %36 = vector.shape_cast %35 : vector<1x8x384xbf16> to vector<8x384xbf16>
    %c6 = arith.constant 6 : index
    %c0_34 = arith.constant 0 : index
    %c0_35 = arith.constant 0 : index
    %37 = vector.load %arg2[%c6, %c0_34, %c0_35] : memref<9x8x8xbf16, #tpu.memory_space<vmem>>, vector<1x8x8xbf16>
    %38 = vector.shape_cast %37 : vector<1x8x8xbf16> to vector<8x8xbf16>
    %cst_36 = arith.constant dense<0.000000e+00> : vector<8x384xf32>
    %39 = tpu.matmul %38, %36, %cst_36 {dimension_numbers = #tpu.dot_dimension_numbers<[1], [0], [0], [1], [0, 0, 1, 1], [], []>} : vector<8x8xbf16>, vector<8x384xbf16>, vector<8x384xf32> -> vector<8x384xf32>
    %40 = arith.addf %34, %39 : vector<8x384xf32>
    %c0_37 = arith.constant 0 : index
    %c0_38 = arith.constant 0 : index
    %c37 = arith.constant 37 : index
    %41 = vector.load %arg1[%c0_37, %c0_38, %c37] : memref<1x8x512xbf16, #tpu.memory_space<vmem>>, vector<1x8x384xbf16>
    %42 = vector.shape_cast %41 : vector<1x8x384xbf16> to vector<8x384xbf16>
    %c7 = arith.constant 7 : index
    %c0_39 = arith.constant 0 : index
    %c0_40 = arith.constant 0 : index
    %43 = vector.load %arg2[%c7, %c0_39, %c0_40] : memref<9x8x8xbf16, #tpu.memory_space<vmem>>, vector<1x8x8xbf16>
    %44 = vector.shape_cast %43 : vector<1x8x8xbf16> to vector<8x8xbf16>
    %cst_41 = arith.constant dense<0.000000e+00> : vector<8x384xf32>
    %45 = tpu.matmul %44, %42, %cst_41 {dimension_numbers = #tpu.dot_dimension_numbers<[1], [0], [0], [1], [0, 0, 1, 1], [], []>} : vector<8x8xbf16>, vector<8x384xbf16>, vector<8x384xf32> -> vector<8x384xf32>
    %46 = arith.addf %40, %45 : vector<8x384xf32>
    %c0_42 = arith.constant 0 : index
    %c0_43 = arith.constant 0 : index
    %c38 = arith.constant 38 : index
    %47 = vector.load %arg1[%c0_42, %c0_43, %c38] : memref<1x8x512xbf16, #tpu.memory_space<vmem>>, vector<1x8x384xbf16>
    %48 = vector.shape_cast %47 : vector<1x8x384xbf16> to vector<8x384xbf16>
    %c8 = arith.constant 8 : index
    %c0_44 = arith.constant 0 : index
    %c0_45 = arith.constant 0 : index
    %49 = vector.load %arg2[%c8, %c0_44, %c0_45] : memref<9x8x8xbf16, #tpu.memory_space<vmem>>, vector<1x8x8xbf16>
    %50 = vector.shape_cast %49 : vector<1x8x8xbf16> to vector<8x8xbf16>
    %cst_46 = arith.constant dense<0.000000e+00> : vector<8x384xf32>
    %51 = tpu.matmul %50, %48, %cst_46 {dimension_numbers = #tpu.dot_dimension_numbers<[1], [0], [0], [1], [0, 0, 1, 1], [], []>} : vector<8x8xbf16>, vector<8x384xbf16>, vector<8x384xf32> -> vector<8x384xf32>
    %52 = arith.addf %46, %51 : vector<8x384xf32>
    %c0_47 = arith.constant 0 : index
    %c0_48 = arith.constant 0 : index
    %53 = vector.load %arg3[%c0_47, %c0_48] : memref<8x1xf32, #tpu.memory_space<vmem>>, vector<8x1xf32>
    %54 = vector.broadcast %53 : vector<8x1xf32> to vector<8x384xf32>
    %55 = arith.addf %52, %54 : vector<8x384xf32>
    %cst_49 = arith.constant 0.000000e+00 : f32
    %56 = vector.broadcast %cst_49 : f32 to vector<8x384xf32>
    %57 = arith.maximumf %55, %56 : vector<8x384xf32>
    %c0_50 = arith.constant 0 : index
    %c0_51 = arith.constant 0 : index
    %c0_52 = arith.constant 0 : index
    %58 = vector.load %arg4[%c0_50, %c0_51, %c0_52] : memref<1x8x384xf32, #tpu.memory_space<vmem>>, vector<1x8x384xf32>
    %59 = vector.shape_cast %58 : vector<1x8x384xf32> to vector<8x384xf32>
    %60 = vector.shape_cast %57 : vector<8x384xf32> to vector<1x8x384xf32>
    tpu.vector_store %arg4[%c0_50, %c0_51, %c0_52], %60 {strides = array<i32>} : memref<1x8x384xf32, #tpu.memory_space<vmem>>, vector<1x8x384xf32>,
    return
  }
  func.func @transform_0(%arg0: i32) -> (i32, i32, i32) {
    %c0_i32 = arith.constant 0 : i32
    %c0_i32_0 = arith.constant 0 : i32
    %c0_i32_1 = arith.constant 0 : i32
    return %arg0, %c0_i32, %c0_i32_0 : i32, i32, i32
  }
  func.func @transform_1(%arg0: i32) -> (i32, i32, i32) {
    %c0_i32 = arith.constant 0 : i32
    %c0_i32_0 = arith.constant 0 : i32
    %c0_i32_1 = arith.constant 0 : i32
    %c0_i32_2 = arith.constant 0 : i32
    return %c0_i32, %c0_i32_0, %c0_i32_1 : i32, i32, i32
  }
  func.func @transform_2(%arg0: i32) -> (i32, i32) {
    %c0_i32 = arith.constant 0 : i32
    %c0_i32_0 = arith.constant 0 : i32
    %c0_i32_1 = arith.constant 0 : i32
    return %c0_i32, %c0_i32_0 : i32, i32
  }
  func.func @transform_3(%arg0: i32) -> (i32, i32, i32) {
    %c0_i32 = arith.constant 0 : i32
    %c0_i32_0 = arith.constant 0 : i32
    %c0_i32_1 = arith.constant 0 : i32
    return %arg0, %c0_i32, %c0_i32_0 : i32, i32, i32
  }
}

</mosaic_0001>

<bundles_post_ra>
// kernel: conv_layer_forward.1
= control target key start
LH: loop header
LB: loop body
LE: loop exit
PB: predicated region body
PF: predicated region fallthrough
CT: control target
= control target key end

     0   :  { %s1427_s12 = smov 0   ;;  %s1576_s0 = inlined_call_operand.vmem [shape: bf16[2,8,512], index: 0, kind: input, shape index: {}]   ;;  %s1577_s1 = inlined_call_operand.vmem [shape: bf16[9,8,8], index: 1, kind: input, shape index: {}]   ;;  %s1578_s2 = inlined_call_operand.vmem [shape: f32[8,1], index: 2, kind: input, shape index: {}]   ;;  %s1579_s3 = inlined_call_operand.vmem [shape: f32[2,8,384], index: 3, kind: output, shape index: {}]  }
   0x1 LB: > { %s1237_s13 = sadd.s32 4294967295, %s1394_s12   ;;  %p1241_p0 = scmp.ge.s32.totalorder %s1394_s12, 1  ;;  %s1394_s12 = sphi %s1427_s12, %s13_s12  }
   0x2   : > { %p137_p1 = scmp.lt.s32.totalorder %s1394_s12, 3 }
   0x4   : > { %p138_p2 = pnand %p1241_p0, %p137_p1 }
   0x5   : > { %p161_p3 = scmp.lt.s32.totalorder (!%p138_p2), %s1237_s13, 1  ;;  %v1396_v0 = vmov (!%p138_p2), 0.0   ;;  %v1397_v1 = vmov (!%p138_p2), 0   ;;  %vm1398_vm0 = vmmov (!%p138_p2), 0   ;;  %s1399_s18 = smov (!%p138_p2), 127   ;;  %v1167_v8 = vld [vmem:[%s1578_s2] sm:$0xff] (!%p138_p2) }
   0x6   : > { %141 = sbr.rel (%p138_p2) target bundleno = 427 (0x1ab), region = 32  ;;  %1308 = vmatprep.subr.bf16.mxu1 (!%p138_p2), %v1396_v0  ;;  %247 = vmatprep.mubr.bf16.mxu0 (!%p138_p2), %v1397_v1  ;;  %s1400_s19 = smov (!%p138_p2), 126   ;;  %vm197_vm1 = vcmask (!%p138_p2), 1039360   ;;  %vm205_vm2 = vcmask (!%p138_p2), 1043456   ;;  %v1245_v19 = vld [vmem:[%s1577_s1 + $0x4] sm:$0xf] (!%p138_p2) }
   0x7   : > { %1310 = vmatprep.mubr.msk.bf16.mxu1 (!%p138_p2), %vm1398_vm0, %v1396_v0  ;;  %1382 = vset.pattern.permute.xlu0 (!%p138_p2), %v1397_v1  ;;  %s1401_s20 = smov (!%p138_p2), 110   ;;  %s1402_s21 = smov (!%p138_p2), 109   ;;  %vm201_vm3 = vcmask (!%p138_p2), 64512   ;;  %vm407_vm4 = vcmask (!%p138_p2), 1031168   ;;  %v174_v29 = vld [vmem:[%s1577_s1] sm:$0xf] (!%p138_p2) }
   0x8   : > { %s1403_s22 = smov (!%p138_p2), 108   ;;  %s1404_s23 = smov (!%p138_p2), 92   ;;  %vm517_vm5 = vcmask (!%p138_p2), 900096   ;;  %v1259_v39 = vld [vmem:[%s1577_s1 + $0x8] sm:$0xf] (!%p138_p2)  ;;  %vm627_vm6 = vcmask (!%p138_p2), 891904  }
   0x9   : > { %s1405_s24 = smov (!%p138_p2), 91   ;;  %s1406_s25 = smov (!%p138_p2), 90   ;;  %v1263_v49 = vld [vmem:[%s1577_s1 + $0xc] sm:$0xf] (!%p138_p2)  ;;  %vm737_vm7 = vcmask (!%p138_p2), 883712   ;;  %vm847_vm8 = vcmask (!%p138_p2), 752640  }
   0xa   : > { %v1267_v59 = vld [vmem:[%s1577_s1 + $0x10] sm:$0xf] (!%p138_p2)  ;;  %vm957_vm9 = vcmask (!%p138_p2), 744448   ;;  %vm1067_vm10 = vcmask (!%p138_p2), 736256  }
   0xd   : > { %s1581_s13 = smov (!%p161_p3, %s1237_s13), 1 }
   0xe   : > { %s1289_s14 = sshll.u32 %s1581_s13, 4 }
   0xf   : > { %s1446_s17 = scalar_lea.vmem %s1576_s0, %s1289_s14 }
  0x10   : > { %v176_v2 = vld [vmem:[%s1446_s17 + $0x8] sm:$0xff]  ;;  %v175_v3 = vld [vmem:[%s1446_s17] sm:$0xff] }
  0x11   : > { %v1248_v4 = vcombine.low %v176_v2, %v176_v2  ;;  %v1450_v5 = vcombine.low %v175_v3, %v175_v3  ;;  %v1249_v6 = vcombine.high %v176_v2, %v176_v2  ;;  %v1247_v7 = vcombine.high %v175_v3, %v175_v3  ;;  %v1387_v13 = vld [vmem:[%s1446_s17 + $0x8] ss:$0 sps:$4 sm:$0xff]  }
  0x12   : > { %v314_v23 = vsel %vm205_vm2, %v1387_v13, 0 }
  0x13   : > { %193 = vrot.lane.b32.xlu1 %v1248_v4, %s1399_s18  ;;  %189 = vrot.lane.b32.xlu0 %v1450_v5, %s1399_s18  ;;  %v308_v21 = vsel %vm205_vm2, %v1450_v5, 0 }
  0x17   : > { %195 = vrot.lane.b32.xlu1 %v1249_v6, %s1399_s18  ;;  %191 = vrot.lane.b32.xlu0 %v1247_v7, %s1399_s18 }
  0x1b   : > { %399 = vrot.lane.b32.xlu0 %v1450_v5, %s1400_s19  ;;  %401 = vrot.lane.b32.xlu1 %v1247_v7, %s1400_s19 }
  0x1f   : > { %403 = vrot.lane.b32.xlu0 %v1248_v4, %s1400_s19  ;;  %405 = vrot.lane.b32.xlu1 %v1249_v6, %s1400_s19 }
  0x23   : > { %509 = vrot.lane.b32.xlu0 %v1450_v5, %s1401_s20  ;;  %511 = vrot.lane.b32.xlu1 %v1247_v7, %s1401_s20 }
  0x27   : > { %513 = vrot.lane.b32.xlu0 %v1248_v4, %s1401_s20  ;;  %515 = vrot.lane.b32.xlu1 %v1249_v6, %s1401_s20 }
  0x2b   : > { %619 = vrot.lane.b32.xlu0 %v1450_v5, %s1402_s21  ;;  %621 = vrot.lane.b32.xlu1 %v1247_v7, %s1402_s21 }
  0x2f   : > { %623 = vrot.lane.b32.xlu0 %v1248_v4, %s1402_s21  ;;  %625 = vrot.lane.b32.xlu1 %v1249_v6, %s1402_s21  ;;  %s1362_s21 = smul.u32 24, %s1581_s13 }
  0x33   : > { %729 = vrot.lane.b32.xlu0 %v1450_v5, %s1403_s22  ;;  %731 = vrot.lane.b32.xlu1 %v1247_v7, %s1403_s22 }
  0x37   : > { %733 = vrot.lane.b32.xlu0 %v1248_v4, %s1403_s22  ;;  %735 = vrot.lane.b32.xlu1 %v1249_v6, %s1403_s22 }
  0x3b   : > { %839 = vrot.lane.b32.xlu0 %v1450_v5, %s1404_s23  ;;  %841 = vrot.lane.b32.xlu1 %v1247_v7, %s1404_s23 }
  0x3f   : > { %843 = vrot.lane.b32.xlu0 %v1248_v4, %s1404_s23  ;;  %845 = vrot.lane.b32.xlu1 %v1249_v6, %s1404_s23 }
  0x43   : > { %949 = vrot.lane.b32.xlu0 %v1450_v5, %s1405_s24  ;;  %951 = vrot.lane.b32.xlu1 %v1247_v7, %s1405_s24 }
  0x47   : > { %953 = vrot.lane.b32.xlu0 %v1248_v4, %s1405_s24  ;;  %955 = vrot.lane.b32.xlu1 %v1249_v6, %s1405_s24  ;;  %s170_s24 = scalar_lea.vmem %s1579_s3, %s1362_s21 }
  0x4b   : > { %1059 = vrot.lane.b32.xlu0 %v1450_v5, %s1406_s25  ;;  %1061 = vrot.lane.b32.xlu1 %v1247_v7, %s1406_s25 }
  0x4f   : > { %1063 = vrot.lane.b32.xlu0 %v1248_v4, %s1406_s25  ;;  %1065 = vrot.lane.b32.xlu1 %v1249_v6, %s1406_s25 }
  0x53   : > { %1170 = vperm.xlu0 %1382, %v1167_v8  }
  0x85   : > { %v194_v9 = vpop.permute.xlu1 %193  ;;  %v190_v10 = vpop.permute.xlu0 %189 }
  0x89   : > { %v196_v11 = vpop.permute.xlu1 %195  ;;  %v192_v12 = vpop.permute.xlu0 %191 }
  0x8a   : > { %v199_v14 = vsel %vm197_vm1, %v192_v12, %v194_v9  ;;  %v198_v15 = vsel %vm197_vm1, %v190_v10, %v192_v12  ;;  %v200_v16 = vsel %vm197_vm1, %v194_v9, %v196_v11 }
  0x8b   : > { %1250 = vmatprep.subr.msk.bf16.mxu0 %vm205_vm2, %v199_v14  ;;  %v207_v17 = vsel %vm205_vm2, %v198_v15, 0  ;;  %v213_v18 = vsel %vm205_vm2, %v200_v16, 0 }
  0x8c   : > { %216 = vmatpush1.bf16.msra.mxu0 %v207_v17  ;;  %1309 = vmatpush3.bf16.msra.mxu1 %v213_v18  ;;  %v1275_v17 = vld [vmem:[%s1577_s1 + $0x18] sm:$0xf] }
  0x8d   : > { %v400_v20 = vpop.permute.xlu0 %399  ;;  %1256 = vmatprep.subr.msk.bf16.mxu0 %vm205_vm2, %v1247_v7  ;;  %1314 = vmatprep.subr.bf16.mxu1 %v1396_v0  ;;  %v402_v22 = vpop.permute.xlu1 %401  ;;  %v1271_v7 = vld [vmem:[%s1577_s1 + $0x14] sm:$0xf] }
  0x8e   : > { %v408_v26 = vsel %vm407_vm4, %v400_v20, %v402_v22 }
  0x8f   : > { %1251 = vmatmul.mubr.msk.bf16.vlgmr.msra.gmra.mrb[0].mxu0 %vm201_vm3, %v1245_v19  ;;  %1311 = vmatmul.mubr.msk.bf16.vlgmr.msra.gmra.mrb[0].mxu1 %vm201_vm3, %v1245_v19  ;;  %v415_v30 = vsel %vm205_vm2, %v408_v26, 0 }
  0x90   : > { %317 = vmatpush1.bf16.msra.mxu0 %v308_v21  ;;  %1315 = vmatpush3.bf16.msra.mxu1 %v314_v23 }
  0x91   : > { %v404_v24 = vpop.permute.xlu0 %403  ;;  %v406_v25 = vpop.permute.xlu1 %405  ;;  %348 = vmatprep.mubr.bf16.mxu0 %v1397_v1  ;;  %1316 = vmatprep.mubr.msk.bf16.mxu1 %vm1398_vm0, %v1396_v0 }
  0x92   : > { %v409_v27 = vsel %vm407_vm4, %v402_v22, %v404_v24  ;;  %v410_v28 = vsel %vm407_vm4, %v404_v24, %v406_v25  ;;  %1320 = vmatprep.subr.bf16.mxu1 %v1396_v0 }
  0x93   : > { %1260 = vmatprep.subr.msk.bf16.mxu0 %vm205_vm2, %v409_v27  ;;  %v421_v31 = vsel %vm205_vm2, %v410_v28, 0  ;;  %v1279_v27 = vld [vmem:[%s1577_s1 + $0x1c] sm:$0xf] }
  0x95   : > { %v510_v32 = vpop.permute.xlu0 %509  ;;  %v512_v33 = vpop.permute.xlu1 %511 }
  0x96   : > { %v518_v36 = vsel %vm517_vm5, %v510_v32, %v512_v33 }
  0x97   : > { %1257 = vmatmul.mubr.msk.bf16.vlgmr.msra.gmra.mrb[4].mxu0 %vm201_vm3, %v174_v29  ;;  %1317 = vmatmul.mubr.msk.bf16.vlgmr.msra.gmra.mrb[4].mxu1 %vm201_vm3, %v174_v29  ;;  %v525_v40 = vsel %vm205_vm2, %v518_v36, 0 }
  0x98   : > { %424 = vmatpush1.bf16.msra.mxu0 %v415_v30  ;;  %1321 = vmatpush3.bf16.msra.mxu1 %v421_v31  ;;  %v1283_v30 = vld [vmem:[%s1577_s1 + $0x20] sm:$0xf] }
  0x99   : > { %v514_v34 = vpop.permute.xlu0 %513  ;;  %v516_v35 = vpop.permute.xlu1 %515  ;;  %455 = vmatprep.mubr.bf16.mxu0 %v1397_v1  ;;  %1322 = vmatprep.mubr.msk.bf16.mxu1 %vm1398_vm0, %v1396_v0 }
  0x9a   : > { %v519_v37 = vsel %vm517_vm5, %v512_v33, %v514_v34  ;;  %v520_v38 = vsel %vm517_vm5, %v514_v34, %v516_v35  ;;  %1326 = vmatprep.subr.bf16.mxu1 %v1396_v0 }
  0x9b   : > { %1264 = vmatprep.subr.msk.bf16.mxu0 %vm205_vm2, %v519_v37  ;;  %v531_v41 = vsel %vm205_vm2, %v520_v38, 0 }
  0x9d   : > { %v620_v42 = vpop.permute.xlu0 %619  ;;  %v622_v43 = vpop.permute.xlu1 %621 }
  0x9e   : > { %v628_v46 = vsel %vm627_vm6, %v620_v42, %v622_v43 }
  0x9f   : > { %1261 = vmatmul.mubr.msk.bf16.vlgmr.msra.gmra.mrb[8].mxu0 %vm201_vm3, %v1259_v39  ;;  %1323 = vmatmul.mubr.msk.bf16.vlgmr.msra.gmra.mrb[8].mxu1 %vm201_vm3, %v1259_v39  ;;  %v635_v50 = vsel %vm205_vm2, %v628_v46, 0 }
  0xa0   : > { %534 = vmatpush1.bf16.msra.mxu0 %v525_v40  ;;  %1327 = vmatpush3.bf16.msra.mxu1 %v531_v41 }
  0xa1   : > { %v624_v44 = vpop.permute.xlu0 %623  ;;  %v626_v45 = vpop.permute.xlu1 %625  ;;  %565 = vmatprep.mubr.bf16.mxu0 %v1397_v1  ;;  %1328 = vmatprep.mubr.msk.bf16.mxu1 %vm1398_vm0, %v1396_v0 }
  0xa2   : > { %v629_v47 = vsel %vm627_vm6, %v622_v43, %v624_v44  ;;  %v630_v48 = vsel %vm627_vm6, %v624_v44, %v626_v45  ;;  %1332 = vmatprep.subr.bf16.mxu1 %v1396_v0 }
  0xa3   : > { %1268 = vmatprep.subr.msk.bf16.mxu0 %vm205_vm2, %v629_v47  ;;  %v641_v51 = vsel %vm205_vm2, %v630_v48, 0 }
  0xa5   : > { %v730_v52 = vpop.permute.xlu0 %729  ;;  %v732_v53 = vpop.permute.xlu1 %731 }
  0xa6   : > { %v738_v56 = vsel %vm737_vm7, %v730_v52, %v732_v53 }
  0xa7   : > { %1265 = vmatmul.mubr.msk.bf16.vlgmr.msra.gmra.mrb[12].mxu0 %vm201_vm3, %v1263_v49  ;;  %1329 = vmatmul.mubr.msk.bf16.vlgmr.msra.gmra.mrb[12].mxu1 %vm201_vm3, %v1263_v49  ;;  %v745_v60 = vsel %vm205_vm2, %v738_v56, 0 }
  0xa8   : > { %644 = vmatpush1.bf16.msra.mxu0 %v635_v50  ;;  %1333 = vmatpush3.bf16.msra.mxu1 %v641_v51 }
  0xa9   : > { %v734_v54 = vpop.permute.xlu0 %733  ;;  %v736_v55 = vpop.permute.xlu1 %735  ;;  %675 = vmatprep.mubr.bf16.mxu0 %v1397_v1  ;;  %1334 = vmatprep.mubr.msk.bf16.mxu1 %vm1398_vm0, %v1396_v0 }
  0xaa   : > { %v739_v57 = vsel %vm737_vm7, %v732_v53, %v734_v54  ;;  %v740_v58 = vsel %vm737_vm7, %v734_v54, %v736_v55  ;;  %1338 = vmatprep.subr.bf16.mxu1 %v1396_v0 }
  0xab   : > { %1272 = vmatprep.subr.msk.bf16.mxu0 %vm205_vm2, %v739_v57  ;;  %v751_v61 = vsel %vm205_vm2, %v740_v58, 0 }
  0xad   : > { %v840_v62 = vpop.permute.xlu0 %839  ;;  %v842_v63 = vpop.permute.xlu1 %841 }
  0xae   : > { %v848_v4 = vsel %vm847_vm8, %v840_v62, %v842_v63 }
  0xaf   : > { %1269 = vmatmul.mubr.msk.bf16.vlgmr.msra.gmra.mrb[16].mxu0 %vm201_vm3, %v1267_v59  ;;  %1335 = vmatmul.mubr.msk.bf16.vlgmr.msra.gmra.mrb[16].mxu1 %vm201_vm3, %v1267_v59  ;;  %v855_v8 = vsel %vm205_vm2, %v848_v4, 0 }
  0xb0   : > { %754 = vmatpush1.bf16.msra.mxu0 %v745_v60  ;;  %1339 = vmatpush3.bf16.msra.mxu1 %v751_v61 }
  0xb1   : > { %v844_v2 = vpop.permute.xlu0 %843  ;;  %v846_v3 = vpop.permute.xlu1 %845  ;;  %785 = vmatprep.mubr.bf16.mxu0 %v1397_v1  ;;  %1340 = vmatprep.mubr.msk.bf16.mxu1 %vm1398_vm0, %v1396_v0 }
  0xb2   : > { %v849_v5 = vsel %vm847_vm8, %v842_v63, %v844_v2  ;;  %v850_v6 = vsel %vm847_vm8, %v844_v2, %v846_v3  ;;  %1344 = vmatprep.subr.bf16.mxu1 %v1396_v0 }
  0xb3   : > { %1276 = vmatprep.subr.msk.bf16.mxu0 %vm205_vm2, %v849_v5  ;;  %v861_v9 = vsel %vm205_vm2, %v850_v6, 0 }
  0xb5   : > { %v950_v10 = vpop.permute.xlu0 %949  ;;  %v952_v11 = vpop.permute.xlu1 %951 }
  0xb6   : > { %v958_v14 = vsel %vm957_vm9, %v950_v10, %v952_v11 }
  0xb7   : > { %1273 = vmatmul.mubr.msk.bf16.vlgmr.msra.gmra.mrb[20].mxu0 %vm201_vm3, %v1271_v7  ;;  %1341 = vmatmul.mubr.msk.bf16.vlgmr.msra.gmra.mrb[20].mxu1 %vm201_vm3, %v1271_v7  ;;  %v965_v18 = vsel %vm205_vm2, %v958_v14, 0 }
  0xb8   : > { %864 = vmatpush1.bf16.msra.mxu0 %v855_v8  ;;  %1345 = vmatpush3.bf16.msra.mxu1 %v861_v9 }
  0xb9   : > { %v954_v12 = vpop.permute.xlu0 %953  ;;  %v956_v13 = vpop.permute.xlu1 %955  ;;  %895 = vmatprep.mubr.bf16.mxu0 %v1397_v1  ;;  %1346 = vmatprep.mubr.msk.bf16.mxu1 %vm1398_vm0, %v1396_v0 }
  0xba   : > { %v959_v15 = vsel %vm957_vm9, %v952_v11, %v954_v12  ;;  %v960_v16 = vsel %vm957_vm9, %v954_v12, %v956_v13  ;;  %1350 = vmatprep.subr.bf16.mxu1 %v1396_v0 }
  0xbb   : > { %1280 = vmatprep.subr.msk.bf16.mxu0 %vm205_vm2, %v959_v15  ;;  %v971_v19 = vsel %vm205_vm2, %v960_v16, 0 }
  0xbd   : > { %v1060_v20 = vpop.permute.xlu0 %1059  ;;  %v1062_v21 = vpop.permute.xlu1 %1061 }
  0xbe   : > { %v1068_v24 = vsel %vm1067_vm10, %v1060_v20, %v1062_v21 }
  0xbf   : > { %1277 = vmatmul.mubr.msk.bf16.vlgmr.msra.gmra.mrb[24].mxu0 %vm201_vm3, %v1275_v17  ;;  %1347 = vmatmul.mubr.msk.bf16.vlgmr.msra.gmra.mrb[24].mxu1 %vm201_vm3, %v1275_v17  ;;  %v1075_v28 = vsel %vm205_vm2, %v1068_v24, 0 }
  0xc0   : > { %974 = vmatpush1.bf16.msra.mxu0 %v965_v18  ;;  %1351 = vmatpush3.bf16.msra.mxu1 %v971_v19 }
  0xc1   : > { %v1064_v22 = vpop.permute.xlu0 %1063  ;;  %v1066_v23 = vpop.permute.xlu1 %1065  ;;  %1005 = vmatprep.mubr.bf16.mxu0 %v1397_v1  ;;  %1352 = vmatprep.mubr.msk.bf16.mxu1 %vm1398_vm0, %v1396_v0 }
  0xc2   : > { %v1069_v25 = vsel %vm1067_vm10, %v1062_v21, %v1064_v22  ;;  %v1070_v26 = vsel %vm1067_vm10, %v1064_v22, %v1066_v23  ;;  %1356 = vmatprep.subr.bf16.mxu1 %v1396_v0 }
  0xc3   : > { %1284 = vmatprep.subr.msk.bf16.mxu0 %vm205_vm2, %v1069_v25  ;;  %v1081_v29 = vsel %vm205_vm2, %v1070_v26, 0 }
  0xc7   : > { %1281 = vmatmul.mubr.msk.bf16.vlgmr.msra.gmra.mrb[28].mxu0 %vm201_vm3, %v1279_v27  ;;  %1353 = vmatmul.mubr.msk.bf16.vlgmr.msra.gmra.mrb[28].mxu1 %vm201_vm3, %v1279_v27 }
  0xc8   : > { %1084 = vmatpush1.bf16.msra.mxu0 %v1075_v28  ;;  %1357 = vmatpush3.bf16.msra.mxu1 %v1081_v29 }
  0xc9   : > { %1115 = vmatprep.mubr.bf16.mxu0 %v1397_v1  ;;  %1358 = vmatprep.mubr.msk.bf16.mxu1 %vm1398_vm0, %v1396_v0 }
  0xcf   : > { %1285 = vmatmul.mubr.msk.bf16.vlgmr.msra.gmra.mrb[32].mxu0 %vm201_vm3, %v1283_v30  ;;  %1359 = vmatmul.mubr.msk.bf16.vlgmr.msra.gmra.mrb[32].mxu1 %vm201_vm3, %v1283_v30 }
 0x162   : > { %v249_v31 = vpop.f32.mrb[0].mxu0  ;;  %v290_v32 = vpop.f32.mrb[0].mxu1 }
 0x163   : > { %v251_v33 = vpop.f32.mrb[1].mxu0  ;;  %v1312_v34 = vpop.f32.mrb[1].mxu1 }
 0x164   : > { %v253_v35 = vpop.f32.mrb[2].mxu0  ;;  %v293_v36 = vpop.f32.mrb[2].mxu1 }
 0x165   : > { %v254_v37 = vpop.f32.mrb[3].mxu0  ;;  %v1313_v38 = vpop.f32.mrb[3].mxu1 }
 0x16a   : > { %v350_v1 = vpop.f32.mrb[4].mxu0  ;;  %v391_v39 = vpop.f32.mrb[4].mxu1 }
 0x16b   : > { %v351_v40 = vadd.f32 %v350_v1, %v249_v31  ;;  %v392_v0 = vadd.f32 %v391_v39, %v290_v32  ;;  %v352_v41 = vpop.f32.mrb[5].mxu0  ;;  %v1318_v42 = vpop.f32.mrb[5].mxu1 }
 0x16c   : > { %v353_v43 = vadd.f32 %v352_v41, %v251_v33  ;;  %v354_v44 = vpop.f32.mrb[6].mxu0  ;;  %v394_v45 = vpop.f32.mrb[6].mxu1 }
 0x16d   : > { %v355_v46 = vpop.f32.mrb[7].mxu0  ;;  %v1319_v47 = vpop.f32.mrb[7].mxu1 }
 0x172   : > { %v457_v48 = vpop.f32.mrb[8].mxu0  ;;  %v498_v49 = vpop.f32.mrb[8].mxu1 }
 0x173   : > { %v504_v50 = vadd.f32 %v457_v48, %v351_v40  ;;  %v506_v51 = vadd.f32 %v498_v49, %v392_v0  ;;  %v459_v52 = vpop.f32.mrb[9].mxu0  ;;  %v1324_v53 = vpop.f32.mrb[9].mxu1 }
 0x174   : > { %v505_v54 = vadd.f32 %v459_v52, %v353_v43  ;;  %v461_v55 = vpop.f32.mrb[10].mxu0  ;;  %v501_v56 = vpop.f32.mrb[10].mxu1 }
 0x175   : > { %v462_v57 = vpop.f32.mrb[11].mxu0  ;;  %v1325_v58 = vpop.f32.mrb[11].mxu1 }
 0x17a   : > { %v567_v59 = vpop.f32.mrb[12].mxu0  ;;  %v608_v60 = vpop.f32.mrb[12].mxu1 }
 0x17b   : > { %v614_v61 = vadd.f32 %v567_v59, %v504_v50  ;;  %v616_v62 = vadd.f32 %v608_v60, %v506_v51  ;;  %v569_v63 = vpop.f32.mrb[13].mxu0  ;;  %v1330_v2 = vpop.f32.mrb[13].mxu1 }
 0x17c   : > { %v615_v3 = vadd.f32 %v569_v63, %v505_v54  ;;  %v571_v4 = vpop.f32.mrb[14].mxu0  ;;  %v611_v5 = vpop.f32.mrb[14].mxu1 }
 0x17d   : > { %v572_v6 = vpop.f32.mrb[15].mxu0  ;;  %v1331_v7 = vpop.f32.mrb[15].mxu1 }
 0x17e   : > { %v1171_v50 = vpop.permute.xlu0 %1170 }
 0x182   : > { %v677_v8 = vpop.f32.mrb[16].mxu0  ;;  %v718_v9 = vpop.f32.mrb[16].mxu1 }
 0x183   : > { %v724_v10 = vadd.f32 %v677_v8, %v614_v61  ;;  %v726_v11 = vadd.f32 %v718_v9, %v616_v62  ;;  %v679_v12 = vpop.f32.mrb[17].mxu0  ;;  %v1336_v13 = vpop.f32.mrb[17].mxu1 }
 0x184   : > { %v725_v14 = vadd.f32 %v679_v12, %v615_v3  ;;  %v681_v15 = vpop.f32.mrb[18].mxu0  ;;  %v721_v16 = vpop.f32.mrb[18].mxu1 }
 0x185   : > { %v682_v17 = vpop.f32.mrb[19].mxu0  ;;  %v1337_v18 = vpop.f32.mrb[19].mxu1 }
 0x18a   : > { %v787_v19 = vpop.f32.mrb[20].mxu0  ;;  %v828_v20 = vpop.f32.mrb[20].mxu1 }
 0x18b   : > { %v834_v21 = vadd.f32 %v787_v19, %v724_v10  ;;  %v836_v22 = vadd.f32 %v828_v20, %v726_v11  ;;  %v789_v23 = vpop.f32.mrb[21].mxu0  ;;  %v1342_v24 = vpop.f32.mrb[21].mxu1 }
 0x18c   : > { %v835_v25 = vadd.f32 %v789_v23, %v725_v14  ;;  %v791_v26 = vpop.f32.mrb[22].mxu0  ;;  %v831_v27 = vpop.f32.mrb[22].mxu1 }
 0x18d   : > { %v792_v28 = vpop.f32.mrb[23].mxu0  ;;  %v1343_v29 = vpop.f32.mrb[23].mxu1 }
 0x192   : > { %v897_v30 = vpop.f32.mrb[24].mxu0  ;;  %v938_v31 = vpop.f32.mrb[24].mxu1 }
 0x193   : > { %v944_v32 = vadd.f32 %v897_v30, %v834_v21  ;;  %v946_v33 = vadd.f32 %v938_v31, %v836_v22  ;;  %v899_v34 = vpop.f32.mrb[25].mxu0  ;;  %v1348_v35 = vpop.f32.mrb[25].mxu1 }
 0x194   : > { %v945_v36 = vadd.f32 %v899_v34, %v835_v25  ;;  %v901_v37 = vpop.f32.mrb[26].mxu0  ;;  %v941_v38 = vpop.f32.mrb[26].mxu1 }
 0x195   : > { %v902_v1 = vpop.f32.mrb[27].mxu0  ;;  %v1349_v39 = vpop.f32.mrb[27].mxu1 }
 0x19a   : > { %v1007_v40 = vpop.f32.mrb[28].mxu0  ;;  %v1048_v0 = vpop.f32.mrb[28].mxu1 }
 0x19b   : > { %v1054_v41 = vadd.f32 %v1007_v40, %v944_v32  ;;  %v1056_v42 = vadd.f32 %v1048_v0, %v946_v33  ;;  %v1009_v43 = vpop.f32.mrb[29].mxu0  ;;  %v1354_v44 = vpop.f32.mrb[29].mxu1 }
 0x19c   : > { %v1055_v45 = vadd.f32 %v1009_v43, %v945_v36  ;;  %v1011_v46 = vpop.f32.mrb[30].mxu0  ;;  %v1051_v47 = vpop.f32.mrb[30].mxu1 }
 0x19d   : > { %v1012_v48 = vpop.f32.mrb[31].mxu0  ;;  %v1355_v49 = vpop.f32.mrb[31].mxu1 }
 0x1a2   : > { %v1117_v51 = vpop.f32.mrb[32].mxu0  ;;  %v1158_v52 = vpop.f32.mrb[32].mxu1 }
 0x1a3   : > { %v1164_v53 = vadd.f32 %v1117_v51, %v1054_v41  ;;  %v1166_v54 = vadd.f32 %v1158_v52, %v1056_v42  ;;  %v1119_v55 = vpop.f32.mrb[33].mxu0  ;;  %v1360_v56 = vpop.f32.mrb[33].mxu1 }
 0x1a4   : > { %v1165_v57 = vadd.f32 %v1119_v55, %v1055_v45  ;;  %v1121_v58 = vpop.f32.mrb[34].mxu0  ;;  %v1161_v59 = vpop.f32.mrb[34].mxu1 }
 0x1a5   : > { %v1173_v60 = vadd.f32 %v1171_v50, %v1164_v53  ;;  %v1175_v61 = vadd.f32 %v1171_v50, %v1166_v54  ;;  %v1122_v62 = vpop.f32.mrb[35].mxu0  ;;  %v1361_v63 = vpop.f32.mrb[35].mxu1 }
 0x1a6   : > { %v1174_v2 = vadd.f32 %v1171_v50, %v1165_v57 }
 0x1a7   : > { %v1176_v3 = vmax.f32 %v1173_v60, 0.0  ;;  %v1178_v4 = vmax.f32 %v1175_v61, 0.0 }
 0x1a8   : > { %v1177_v5 = vmax.f32 %v1174_v2, 0.0 }
 0x1a9   : > { %1179 = vst [vmem:[%s170_s24] sm:$0xff] %v1176_v3  ;;  %1181 = vst [vmem:[%s170_s24 + $0x10] sm:$0xff] %v1178_v4 }
 0x1aa   : > { %1180 = vst [vmem:[%s170_s24 + $0x8] sm:$0xff] %v1177_v5 }
 0x1ab PF: > { %s13_s12 = sadd.s32 1, %s1394_s12  }
 0x1ac   : > { %p10_p4 = scmp.ge.s32.totalorder %s13_s12, 4  }
 0x1ae   :  { %12 = sbr.rel (!%p10_p4) target bundleno = 1 (0x1), region = 70 }

</bundles_post_ra>
